<compile_context>
chip_gen: v5e
topology: v5e:2x2
jax: 0.10.0
libtpu: 0.0.40
codegen_flags: <defaults>
</compile_context>

<pallas_src>
import jax
import jax.numpy as jnp
from jax.experimental import pallas as pl
from jax.experimental.pallas import tpu as pltpu

_LANE = 128
_SUBLANE = 8


def _round_up(x, m):
    return ((x + m - 1) // m) * m


def _vmem_limits():
    """(tile budget bytes, vmem_limit_bytes) — safe across v5e/v6e (128 MiB) and v7x (64 MiB)."""
    try:
        cap = int(pltpu.get_tpu_info().vmem_capacity_bytes)
    except Exception:
        cap = 64 * 1024 * 1024  # conservative: assume the smallest (v7x)
    limit = int(cap * 0.70)      # scoped VMEM we request from Mosaic
    budget = max(8 * 1024 * 1024, int(limit * 0.55))  # what our tiles may consume
    return budget, limit


# ---------------------------------------------------------------------------
# Kernel 1: generic residual add  (out = fn_out + x), lane-dense tiling.
# ---------------------------------------------------------------------------
def _residual_add_kernel(fx_ref, x_ref, o_ref):
    o_ref[...] = fx_ref[...] + x_ref[...]


def _pick_lane_width(n):
    """Largest multiple of 128 dividing n, preferring widths that leave >=8 rows."""
    candidates = (8192, 4096, 2048, 1024, 512, 256, 128)
    for lane in candidates:
        if n % lane == 0 and n // lane >= _SUBLANE:
            return lane
    for lane in candidates:
        if n % lane == 0:
            return lane
    return None


def _residual_add(fx, x):
    assert fx.shape == x.shape and fx.dtype == x.dtype
    orig_shape = x.shape
    n = x.size
    itemsize = jnp.dtype(x.dtype).itemsize

    lane = _pick_lane_width(n)
    if lane is None:
        # Element count not a multiple of 128: a standalone Pallas add would be
        # lane-sparse; let XLA fuse the add into fn's epilogue instead.
        return fx + x

    rows = n // lane
    budget, limit = _vmem_limits()

    # 3 streams (fx, x, out), each double-buffered by the pipeline -> ~6x tile bytes.
    tm = budget // (6 * lane * itemsize)
    tm = max(_SUBLANE, (tm // _SUBLANE) * _SUBLANE)
    tm = min(tm, 2048)  # per-step overhead already amortised well before this
    if rows <= _SUBLANE:
        tm = rows  # block == full extent is always layout-legal
    else:
        # keep >=2 grid steps so the parallel axis can shard across v7x's 2 cores
        tm = min(tm, _round_up(pl.cdiv(rows, 2), _SUBLANE))
        tm = max(tm, _SUBLANE)

    grid = (pl.cdiv(rows, tm),)
    fx2 = fx.reshape(rows, lane)
    x2 = x.reshape(rows, lane)

    out2 = pl.pallas_call(
        _residual_add_kernel,
        out_shape=jax.ShapeDtypeStruct((rows, lane), x.dtype),
        grid=grid,
        in_specs=[
            pl.BlockSpec((tm, lane), lambda i: (i, 0)),
            pl.BlockSpec((tm, lane), lambda i: (i, 0)),
        ],
        out_specs=pl.BlockSpec((tm, lane), lambda i: (i, 0)),
        input_output_aliases={0: 0},  # write the result in place of fx
        cost_estimate=pl.CostEstimate(
            flops=int(n), transcendentals=0, bytes_accessed=int(3 * n * itemsize)
        ),
        compiler_params=pltpu.CompilerParams(
            dimension_semantics=("parallel",),
            vmem_limit_bytes=int(limit),
        ),
    )(fx2, x2)
    return out2.reshape(orig_shape)


class Residual:
    """JAX/Pallas port of the PyTorch Residual wrapper: fn(x, *a, **kw) + x."""

    def __init__(self, fn):
        self.fn = fn

    def __call__(self, x, *args, **kwargs):
        fx = self.fn(x, *args, **kwargs)  # arbitrary wrapped fn (plain JAX glue)
        return _residual_add(fx, x)       # residual add in the Pallas kernel


# ---------------------------------------------------------------------------
# Kernel 2: fully fused Residual(1x1 conv), NCHW kept, spatial on the lane axis:
#   out[n, :, s] = W @ x[n, :, s] + b + x[n, :, s],   s over H*W
# ---------------------------------------------------------------------------
def _residual_pointwise_kernel(x_ref, w_ref, b_ref, o_ref):
    x = x_ref[...]                                                   # (C_in, ts)  lane-dense
    y = jnp.dot(w_ref[...], x, preferred_element_type=jnp.float32)   # (C_out, ts) MXU, free dim >=128
    y = y + b_ref[...]                                                # (C_out, 1) bias broadcast
    o_ref[...] = (y + x.astype(jnp.float32)).astype(o_ref.dtype)      # residual add


def residual_pointwise_conv(x_nchw, w_cout_cin, b):
    """Fused Residual(1x1 conv). Weight is PyTorch layout W[c_out, c_in] (no transpose)."""
    N, C, H, W = x_nchw.shape
    S = H * W
    itemsize = jnp.dtype(x_nchw.dtype).itemsize
    budget, limit = _vmem_limits()

    x3 = x_nchw.reshape(N, C, S)     # free reshape, no transpose
    b2 = b.reshape(C, 1)

    if S % _LANE == 0:
        ts = budget // (6 * C * itemsize)          # x + out streams, double-buffered
        ts = max(_LANE, (ts // _LANE) * _LANE)
        ts = min(ts, S)
    else:
        ts = S                                     # full extent is always layout-legal
    grid = (N, pl.cdiv(S, ts))

    out3 = pl.pallas_call(
        _residual_pointwise_kernel,
        out_shape=jax.ShapeDtypeStruct((N, C, S), x_nchw.dtype),
        grid=grid,
        in_specs=[
            pl.BlockSpec((pl.Squeezed(), C, ts), lambda n, s: (n, 0, s)),
            pl.BlockSpec((C, C), lambda n, s: (0, 0)),
            pl.BlockSpec((C, 1), lambda n, s: (0, 0)),
        ],
        out_specs=pl.BlockSpec((pl.Squeezed(), C, ts), lambda n, s: (n, 0, s)),
        cost_estimate=pl.CostEstimate(
            flops=int(2 * N * C * C * S + 2 * N * C * S),
            transcendentals=0,
            bytes_accessed=int((2 * N * C * S + C * C + C) * itemsize),
        ),
        compiler_params=pltpu.CompilerParams(
            dimension_semantics=("parallel", "parallel"),
            vmem_limit_bytes=int(limit),
        ),
    )(x3, w_cout_cin, b2)
    return out3.reshape(N, C, H, W)


# ---------------------------------------------------------------------------
if __name__ == "__main__":
    key = jax.random.PRNGKey(0)
    k_x, k_w, k_b = jax.random.split(key, 3)

    # Small NCHW input consistent with the UNet usage of Residual.
    N, C, H, W = 2, 8, 16, 16
    x = jax.random.normal(k_x, (N, C, H, W), dtype=jnp.float32)

    # Deterministic parameters for the example wrapped fn (a 1x1 conv,
    # PyTorch conv weight layout W[c_out, c_in]).
    w = jax.random.normal(k_w, (C, C), dtype=jnp.float32) * 0.1
    b = jax.random.normal(k_b, (C,), dtype=jnp.float32) * 0.1

    # fn(x)[n, d, h, w] = sum_c W[d, c] * x[n, c, h, w] + b[d]
    def fn(t):
        return jnp.einsum("nchw,dc->ndhw", t, w) + b[None, :, None, None]

    # Path 1: generic Residual wrapper (fn in JAX, residual add in Pallas).
    out_generic = Residual(fn)(x)

    # Path 2: fully fused Residual(1x1 conv) Pallas kernel (matmul + bias + add),
    # NCHW in/out, no transposes.
    out_fused = residual_pointwise_conv(x, w, b)

    ref = fn(x) + x
    jax.block_until_ready((out_generic, out_fused))

    assert out_generic.shape == x.shape and out_fused.shape == x.shape
    assert jnp.allclose(out_generic, ref, atol=1e-5, rtol=1e-5)
    assert jnp.allclose(out_fused, ref, atol=1e-5, rtol=1e-5)

    print("KERNEL_OK")
</pallas_src>

<mosaic_0001>
module attributes {stable_mosaic.version = 11 : i64} {
  func.func @_residual_add_kernel(%arg0: i32, %arg1: memref<8x512xf32, #tpu.memory_space<vmem>>, %arg2: memref<8x512xf32, #tpu.memory_space<vmem>>, %arg3: memref<8x512xf32, #tpu.memory_space<vmem>>) attributes {dimension_semantics = [#tpu.dimension_semantics<parallel>], iteration_bounds = array<i64: 1>, scalar_prefetch = 0 : i64, scratch_operands = 0 : i64, tpu.core_type = #tpu.core_type<tc>, window_params = [{transform_indices = @transform_0, window_bounds = array<i64: 8, 512>}, {transform_indices = @transform_1, window_bounds = array<i64: 8, 512>}, {transform_indices = @transform_2, window_bounds = array<i64: 8, 512>}]} {
    %c0 = arith.constant 0 : index
    %c0_0 = arith.constant 0 : index
    %0 = vector.load %arg1[%c0, %c0_0] : memref<8x512xf32, #tpu.memory_space<vmem>>, vector<8x512xf32>
    %c0_1 = arith.constant 0 : index
    %c0_2 = arith.constant 0 : index
    %1 = vector.load %arg2[%c0_1, %c0_2] : memref<8x512xf32, #tpu.memory_space<vmem>>, vector<8x512xf32>
    %2 = arith.addf %0, %1 : vector<8x512xf32>
    %c0_3 = arith.constant 0 : index
    %c0_4 = arith.constant 0 : index
    %3 = vector.load %arg3[%c0_3, %c0_4] : memref<8x512xf32, #tpu.memory_space<vmem>>, vector<8x512xf32>
    tpu.vector_store %arg3[%c0_3, %c0_4], %2 {strides = array<i32>} : memref<8x512xf32, #tpu.memory_space<vmem>>, vector<8x512xf32>,
    return
  }
  func.func @transform_0(%arg0: i32) -> (i32, i32) {
    %c0_i32 = arith.constant 0 : i32
    %c0_i32_0 = arith.constant 0 : i32
    return %arg0, %c0_i32 : i32, i32
  }
  func.func @transform_1(%arg0: i32) -> (i32, i32) {
    %c0_i32 = arith.constant 0 : i32
    %c0_i32_0 = arith.constant 0 : i32
    return %arg0, %c0_i32 : i32, i32
  }
  func.func @transform_2(%arg0: i32) -> (i32, i32) {
    %c0_i32 = arith.constant 0 : i32
    %c0_i32_0 = arith.constant 0 : i32
    return %arg0, %c0_i32 : i32, i32
  }
}

</mosaic_0001>

<bundles_post_ra>
// kernel: tpu_custom_call.1
= control target key start
LH: loop header
LB: loop body
LE: loop exit
PB: predicated region body
PF: predicated region fallthrough
CT: control target
= control target key end

     0   :  { %7 = vsyncpa [#allocation3], 0  ;;  %s148_s0 = inlined_call_operand.hbm [shape: f32[8,512], index: 0, kind: input, shape index: {}, may-alias: {0,2}]   ;;  %s149_s1 = inlined_call_operand.vmem [shape: f32[8,512], index: 1, kind: input, shape index: {}]   ;;  %s150_s2 = inlined_call_operand.hbm [shape: f32[8,512], index: 2, kind: output, shape index: {}, may-alias: {0,2}]  }
   0x1   :  { %8 = vsyncpa [#allocation4], 0  ;;  %s14_s11 = sshll.u32 %s148_s0, 4  ;;  %s113_s12 = smov [#allocation2]   ;;  %s15_s11 = int_to_ptr.hbm [resolvable:$true] %s14_s11 }
   0x2   :  { %s16_s13 = sshll.u32 %s113_s12, 4  ;;  %s17_s13 = int_to_ptr.vmem [resolvable:$true] %s16_s13 }
   0x3   :  { %19 = dma.hbm_to_vmem [thread:$0]  %s15_s11, 512, %s17_s13, [#allocation3]  }
   0x4   :  { %109 = dma.done.wait [#allocation3], 512  }
   0x5   :  { %110 = vsyncadd [#allocation3], 4294966784  ;;  %v26_v0 = vld [vmem:[#allocation2] sm:$0xff]  ;;  %v27_v2 = vld [vmem:[#allocation2 + $0x8] sm:$0xff]  ;;  %s114_s19 = smov [#allocation5]   ;;  %s49_s23 = sshll.u32 %s150_s2, 4  ;;  %s50_s23 = int_to_ptr.hbm [resolvable:$true] %s49_s23 }
   0x6   :  { %v30_v1 = vld [vmem:[%s149_s1] sm:$0xff]  ;;  %v31_v4 = vld [vmem:[%s149_s1 + $0x8] sm:$0xff]  ;;  %v28_v5 = vld [vmem:[#allocation2 + $0x10] sm:$0xff]  ;;  %s47_s20 = sshll.u32 %s114_s19, 4  ;;  %s48_s20 = int_to_ptr.vmem [resolvable:$true] %s47_s20 }
   0x7   :  { %v34_v3 = vadd.f32 %v30_v1, %v26_v0  ;;  %v32_v6 = vld [vmem:[%s149_s1 + $0x10] sm:$0xff]  ;;  %v35_v7 = vadd.f32 %v31_v4, %v27_v2  ;;  %v29_v9 = vld [vmem:[#allocation2 + $0x18] sm:$0xff] }
   0x8   :  { %v36_v8 = vadd.f32 %v32_v6, %v28_v5  ;;  %v33_v10 = vld [vmem:[%s149_s1 + $0x18] sm:$0xff] }
   0x9   :  { %38 = vst [vmem:[#allocation5] sm:$0xff] %v34_v3  ;;  %v37_v11 = vadd.f32 %v33_v10, %v29_v9 }
   0xa   :  { %39 = vst [vmem:[#allocation5 + $0x8] sm:$0xff] %v35_v7 }
   0xb   :  { %40 = vst [vmem:[#allocation5 + $0x10] sm:$0xff] %v36_v8 }
   0xc   :  { %41 = vst [vmem:[#allocation5 + $0x18] sm:$0xff] %v37_v11 }
   0xd   :  { %52 = dma.vmem_to_hbm [thread:$0]  %s48_s20, 512, %s50_s23, [#allocation4]  }
   0xe   :  { %111 = dma.done.wait [#allocation4], 512  }
   0xf   :  { %112 = vsyncadd [#allocation4], 4294966784 }
  0x10   :  { %57 = vsyncpa [#allocation3], 1 }
  0x11   :  { %58 = vsyncpa [#allocation4], 1 }

</bundles_post_ra>
